<compile_context>
chip_gen: v5e
topology: v5e:2x2
jax: 0.10.0
libtpu: 0.0.40
codegen_flags: <defaults>
</compile_context>

<pallas_src>
import functools

import jax
import jax.numpy as jnp
from jax.experimental import pallas as pl
from jax.experimental.pallas import tpu as pltpu


_TARGET_BLOCK_BYTES = 4 * 1024 * 1024   # aim for ~4 MiB of input per grid step
_MIN_STEP_BYTES = 1 * 1024 * 1024       # only force >=4 steps if blocks stay >= this
_TB_MAX = 32                            # bound on batch elems per block (bounds the
                                        # tiny per-batch gate concat unrolling)
_RESIDENT_COPIES = 5                    # 2x dbl-buffered in + 2x out + in-kernel temps


def _min_sublane(dtype):
    """Minimum sublane tile for a dtype: f32 -> 8, bf16/f16 -> 16, int8/fp8 -> 32."""
    return {4: 8, 2: 16, 1: 32}.get(jnp.dtype(dtype).itemsize, 8)


def _vmem_capacity_bytes():
    """Per-core VMEM capacity (128 MiB on v5e/v6e, 64 MiB on v7x)."""
    cap = None
    try:
        info = pltpu.get_tpu_info()
        cap = getattr(info, "vmem_capacity_bytes", None)
    except Exception:
        cap = None
    if not cap:
        cap = 64 * 1024 * 1024          # conservative default (v7x-sized)
    return int(min(max(int(cap), 32 * 1024 * 1024), 128 * 1024 * 1024))


def _vmem_budgets():
    cap = _vmem_capacity_bytes()
    block_budget = max(16 * 1024 * 1024, cap - 24 * 1024 * 1024)  # 104 MiB / 40 MiB
    vmem_limit = max(32 * 1024 * 1024, cap - 16 * 1024 * 1024)    # 112 MiB / 48 MiB
    return block_budget, vmem_limit


def _pick_tb(bs, in_ch, sub_min, cap):
    """Largest divisor tb of bs with tb <= cap and (tb*in_ch) sublane-aligned
    (or tb == bs, which is always legal as a full-dimension block)."""
    cap = max(1, min(bs, cap))
    for d in range(cap, 0, -1):
        if bs % d == 0 and ((d * in_ch) % sub_min == 0 or d == bs):
            return d
    return None


# ----------------------------- single-pass kernel -----------------------------

def _se_block_kernel(x_ref, w1_ref, w2_ref, o_ref, *, in_ch):
    # x_ref / o_ref: (TB*C, S) in the input's native dtype.
    n, s = x_ref.shape
    tb = n // in_ch
    inv_s = jnp.float32(1.0 / s)

    # Squeeze: one whole-block fused reduction over the lane (S) axis,
    # accumulated in f32.  Result (TB*C, 1) is already in gate layout.
    sums = jnp.sum(x_ref[...], axis=-1, keepdims=True, dtype=jnp.float32)

    # Excitation: all TB batch elements as columns of one small matmul chain.
    # Only these tiny (C, 1) slices / concats are per-batch work (off the
    # slab path; tb is bounded by _TB_MAX).
    y = jnp.concatenate(
        [sums[t * in_ch:(t + 1) * in_ch, :] for t in range(tb)], axis=1) * inv_s  # (C, TB)
    h = jnp.maximum(
        jnp.dot(w1_ref[...].astype(jnp.float32), y,
                preferred_element_type=jnp.float32), 0.0)                          # (B, TB)
    g = jax.nn.sigmoid(
        jnp.dot(w2_ref[...].astype(jnp.float32), h,
                preferred_element_type=jnp.float32))                               # (C, TB)
    gate = jnp.concatenate(
        [g[:, t:t + 1] for t in range(tb)], axis=0).astype(o_ref.dtype)            # (TB*C, 1)

    # Scale: one whole-block broadcast multiply in the native dtype (only the
    # tiny gate is cast down) -> lane-dense unmasked stores.
    o_ref[...] = x_ref[...] * gate


def _se_block_single_pass(x, w1, w2, tb, vmem_limit):
    bs, in_ch, seq_len = x.shape
    bneck = w1.shape[0]
    itemsize = x.dtype.itemsize
    n_rows = tb * in_ch

    x2d = x.reshape(bs * in_ch, seq_len)          # free row-major collapse
    kernel = functools.partial(_se_block_kernel, in_ch=in_ch)

    out2d = pl.pallas_call(
        kernel,
        out_shape=jax.ShapeDtypeStruct((bs * in_ch, seq_len), x.dtype),
        grid_spec=pltpu.PrefetchScalarGridSpec(
            num_scalar_prefetch=0,
            grid=(bs // tb,),
            in_specs=[
                pl.BlockSpec((n_rows, seq_len), lambda b: (b, 0)),
                pl.BlockSpec((bneck, in_ch), lambda b: (0, 0)),
                pl.BlockSpec((in_ch, bneck), lambda b: (0, 0)),
            ],
            out_specs=pl.BlockSpec((n_rows, seq_len), lambda b: (b, 0)),
        ),
        compiler_params=pltpu.CompilerParams(
            dimension_semantics=("parallel",),
            vmem_limit_bytes=vmem_limit,
        ),
        cost_estimate=pl.CostEstimate(
            flops=2 * bs * in_ch * (seq_len + 2 * bneck),
            transcendentals=bs * in_ch,
            bytes_accessed=2 * bs * in_ch * seq_len * itemsize,
        ),
    )(x2d, w1, w2)
    return out2d.reshape(bs, in_ch, seq_len)


# --------------------------- two-pass fallback path ---------------------------

def _scale_kernel(x_ref, g_ref, o_ref):
    # x_ref: (TR, TS); g_ref: (TR, 1) f32 per-row gate.
    o_ref[...] = x_ref[...] * g_ref[...].astype(o_ref.dtype)


def _aligned_tile(dim, align, max_size):
    """Full dim if dim <= align (always legal), else the largest multiple of
    `align` <= min(dim, max_size); edge blocks handled by cdiv grid + masking."""
    if dim <= align:
        return dim
    t = max(align, min(dim, max_size))
    return (t // align) * align


def _se_block_two_pass(x, w1, w2, vmem_limit):
    bs, in_ch, seq_len = x.shape
    itemsize = x.dtype.itemsize
    sub_min = _min_sublane(x.dtype)
    n_rows = bs * in_ch

    # Pass 1 (tiny, O(bs*C) output): per-(b, c) mean + excitation gate in JAX.
    y = jnp.mean(x, axis=-1, dtype=jnp.float32)                  # (bs, C)
    h = jnp.maximum(y @ w1.T.astype(jnp.float32), 0.0)           # (bs, B)
    g = jax.nn.sigmoid(h @ w2.T.astype(jnp.float32))             # (bs, C)
    g2d = g.reshape(n_rows, 1)                                   # (bs*C, 1)
    x2d = x.reshape(n_rows, seq_len)

    # Pass 2: scale-only Pallas kernel over dtype-aware (sub_min, 128)-aligned
    # tiles; pl.cdiv grids with masked edges instead of odd exact divisors.
    ts = _aligned_tile(seq_len, 128,
                       max(128, _TARGET_BLOCK_BYTES // (sub_min * itemsize)))
    tr = _aligned_tile(n_rows, sub_min,
                       max(sub_min, _TARGET_BLOCK_BYTES // (ts * itemsize)))
    grid = (pl.cdiv(n_rows, tr), pl.cdiv(seq_len, ts))

    out2d = pl.pallas_call(
        _scale_kernel,
        out_shape=jax.ShapeDtypeStruct((n_rows, seq_len), x.dtype),
        grid_spec=pltpu.PrefetchScalarGridSpec(
            num_scalar_prefetch=0,
            grid=grid,
            in_specs=[
                pl.BlockSpec((tr, ts), lambda r, s: (r, s)),
                pl.BlockSpec((tr, 1), lambda r, s: (r, 0)),
            ],
            out_specs=pl.BlockSpec((tr, ts), lambda r, s: (r, s)),
        ),
        compiler_params=pltpu.CompilerParams(
            dimension_semantics=("parallel", "parallel"),
            vmem_limit_bytes=vmem_limit,
        ),
        cost_estimate=pl.CostEstimate(
            flops=n_rows * seq_len,
            transcendentals=0,
            bytes_accessed=2 * n_rows * seq_len * itemsize,
        ),
    )(x2d, g2d)
    return out2d.reshape(bs, in_ch, seq_len)


# ---------------------------------- wrapper -----------------------------------

def se_block(x, w1, w2, *, force_two_pass=False):
    """x: (bs, in_ch, seq_len); w1: (bottleneck, in_ch); w2: (in_ch, bottleneck)."""
    bs, in_ch, seq_len = x.shape
    bneck = w1.shape[0]
    assert w1.shape == (bneck, in_ch) and w2.shape == (in_ch, bneck)

    itemsize = x.dtype.itemsize
    sub_min = _min_sublane(x.dtype)
    block_budget, vmem_limit = _vmem_budgets()

    slab_bytes = in_ch * seq_len * itemsize          # one batch element's slab
    max_tb_vmem = block_budget // (_RESIDENT_COPIES * slab_bytes)

    if force_two_pass or max_tb_vmem < 1:
        return _se_block_two_pass(x, w1, w2, vmem_limit)

    # Byte-targeted batch block: big enough to amortize the ~0.35 us per-step
    # overhead, small enough to fit the generation's VMEM budget.
    cap = min(bs, max_tb_vmem, _TB_MAX,
              max(1, _TARGET_BLOCK_BYTES // slab_bytes))
    # Prefer >= 4 grid steps (keeps both v7x TensorCores loaded and hides
    # prologue/epilogue DMA) as long as blocks stay reasonably sized.
    if bs >= 4 and (bs // 4) * slab_bytes >= _MIN_STEP_BYTES:
        cap = min(cap, bs // 4)

    tb = _pick_tb(bs, in_ch, sub_min, cap)
    if tb is None:
        # in_ch is not sublane-aligned and no aligned batch block exists; a
        # single full-array block is still legal (block == full dims) if it
        # fits, otherwise fall back to two passes.
        if bs <= max_tb_vmem and bs <= _TB_MAX:
            tb = bs
        else:
            return _se_block_two_pass(x, w1, w2, vmem_limit)

    return _se_block_single_pass(x, w1, w2, tb, vmem_limit)


def se_block_ref(x, w1, w2):
    """Pure-JAX reference mirroring the PyTorch module semantics."""
    y = jnp.mean(x.astype(jnp.float32), axis=-1)                # (bs, C)
    h = jnp.maximum(y @ w1.T.astype(jnp.float32), 0.0)          # (bs, B)
    s = jax.nn.sigmoid(h @ w2.T.astype(jnp.float32))            # (bs, C)
    return (x.astype(jnp.float32) * s[:, :, None]).astype(x.dtype)


if __name__ == "__main__":
    # Module defaults: in_channels=8, bottleneck_channels=4. Lane-dense seq_len.
    bs, in_ch, bneck, seq_len = 8, 8, 4, 128

    key = jax.random.PRNGKey(0)
    kx, k1, k2 = jax.random.split(key, 3)

    x = jax.random.normal(kx, (bs, in_ch, seq_len), dtype=jnp.float32)
    # Deterministic synthetic weights in nn.Linear layout (out_features, in_features).
    w1 = jax.random.normal(k1, (bneck, in_ch), dtype=jnp.float32) * 0.3
    w2 = jax.random.normal(k2, (in_ch, bneck), dtype=jnp.float32) * 0.3

    ref = se_block_ref(x, w1, w2)

    # Single-pass (batch-blocked, whole-block-vectorized) path.
    out = jax.block_until_ready(se_block(x, w1, w2))
    assert out.shape == (bs, in_ch, seq_len)
    assert jnp.allclose(out, ref, atol=1e-5, rtol=1e-5)

    # Two-pass fallback path (normally used only when one (C, S) slab cannot
    # fit the VMEM budget); exercised explicitly here.
    out2 = jax.block_until_ready(se_block(x, w1, w2, force_two_pass=True))
    assert jnp.allclose(out2, ref, atol=1e-5, rtol=1e-5)

    # bf16 input: exercises the 16-row min-sublane-tile path; the gate
    # multiply runs in bf16 (gate cast down), so allow ~1 bf16 ulp vs the
    # f32-accurate reference.
    xb = x.astype(jnp.bfloat16)
    outb = jax.block_until_ready(se_block(xb, w1, w2))
    refb = se_block_ref(xb, w1, w2)
    assert jnp.allclose(outb.astype(jnp.float32), refb.astype(jnp.float32),
                        atol=3e-2, rtol=3e-2)

    print("KERNEL_OK")
</pallas_src>

<mosaic_0001>
module attributes {stable_mosaic.version = 11 : i64} {
  func.func @_se_block_kernel(%arg0: i32, %arg1: memref<64x128xf32, #tpu.memory_space<vmem>>, %arg2: memref<4x8xf32, #tpu.memory_space<vmem>>, %arg3: memref<8x4xf32, #tpu.memory_space<vmem>>, %arg4: memref<64x128xf32, #tpu.memory_space<vmem>>) attributes {dimension_semantics = [#tpu.dimension_semantics<parallel>], iteration_bounds = array<i64: 1>, scalar_prefetch = 0 : i64, scratch_operands = 0 : i64, tpu.core_type = #tpu.core_type<tc>, window_params = [{transform_indices = @transform_0, window_bounds = array<i64: 64, 128>}, {pipeline_mode = #tpu.pipeline_mode<synchronous>, transform_indices = @transform_1, window_bounds = array<i64: 4, 8>}, {pipeline_mode = #tpu.pipeline_mode<synchronous>, transform_indices = @transform_2, window_bounds = array<i64: 8, 4>}, {transform_indices = @transform_3, window_bounds = array<i64: 64, 128>}]} {
    %c0 = arith.constant 0 : index
    %c0_0 = arith.constant 0 : index
    %0 = vector.load %arg1[%c0, %c0_0] : memref<64x128xf32, #tpu.memory_space<vmem>>, vector<64x128xf32>
    %cst = arith.constant dense<0.000000e+00> : vector<64xf32>
    %1 = vector.multi_reduction <add>, %0, %cst [1] : vector<64x128xf32> to vector<64xf32>
    %2 = vector.shape_cast %1 : vector<64xf32> to vector<64x1xf32>
    %3 = vector.extract_strided_slice %2 {offsets = [0, 0], sizes = [8, 1], strides = [1, 1]} : vector<64x1xf32> to vector<8x1xf32>
    %4 = vector.extract_strided_slice %2 {offsets = [8, 0], sizes = [8, 1], strides = [1, 1]} : vector<64x1xf32> to vector<8x1xf32>
    %5 = vector.extract_strided_slice %2 {offsets = [16, 0], sizes = [8, 1], strides = [1, 1]} : vector<64x1xf32> to vector<8x1xf32>
    %6 = vector.extract_strided_slice %2 {offsets = [24, 0], sizes = [8, 1], strides = [1, 1]} : vector<64x1xf32> to vector<8x1xf32>
    %7 = vector.extract_strided_slice %2 {offsets = [32, 0], sizes = [8, 1], strides = [1, 1]} : vector<64x1xf32> to vector<8x1xf32>
    %8 = vector.extract_strided_slice %2 {offsets = [40, 0], sizes = [8, 1], strides = [1, 1]} : vector<64x1xf32> to vector<8x1xf32>
    %9 = vector.extract_strided_slice %2 {offsets = [48, 0], sizes = [8, 1], strides = [1, 1]} : vector<64x1xf32> to vector<8x1xf32>
    %10 = vector.extract_strided_slice %2 {offsets = [56, 0], sizes = [8, 1], strides = [1, 1]} : vector<64x1xf32> to vector<8x1xf32>
    %11 = tpu.concatenate %3, %4, %5, %6, %7, %8, %9, %10 in 1 : vector<8x1xf32>, vector<8x1xf32>, vector<8x1xf32>, vector<8x1xf32>, vector<8x1xf32>, vector<8x1xf32>, vector<8x1xf32>, vector<8x1xf32> -> vector<8x8xf32>
    %cst_1 = arith.constant 7.812500e-03 : f32
    %12 = vector.broadcast %cst_1 : f32 to vector<8x8xf32>
    %13 = arith.mulf %11, %12 : vector<8x8xf32>
    %c0_2 = arith.constant 0 : index
    %c0_3 = arith.constant 0 : index
    %14 = vector.load %arg2[%c0_2, %c0_3] : memref<4x8xf32, #tpu.memory_space<vmem>>, vector<4x8xf32>
    %cst_4 = arith.constant dense<0.000000e+00> : vector<4x8xf32>
    %15 = tpu.matmul %14, %13, %cst_4 {dimension_numbers = #tpu.dot_dimension_numbers<[1], [0], [0], [1], [0, 0, 1, 1], [], []>} : vector<4x8xf32>, vector<8x8xf32>, vector<4x8xf32> -> vector<4x8xf32>
    %cst_5 = arith.constant 0.000000e+00 : f32
    %16 = vector.broadcast %cst_5 : f32 to vector<4x8xf32>
    %17 = arith.maximumf %15, %16 : vector<4x8xf32>
    %c0_6 = arith.constant 0 : index
    %c0_7 = arith.constant 0 : index
    %18 = vector.load %arg3[%c0_6, %c0_7] : memref<8x4xf32, #tpu.memory_space<vmem>>, vector<8x4xf32>
    %cst_8 = arith.constant dense<0.000000e+00> : vector<8x8xf32>
    %19 = tpu.matmul %18, %17, %cst_8 {dimension_numbers = #tpu.dot_dimension_numbers<[1], [0], [0], [1], [0, 0, 1, 1], [], []>} : vector<8x4xf32>, vector<4x8xf32>, vector<8x8xf32> -> vector<8x8xf32>
    %20 = arith.negf %19 : vector<8x8xf32>
    %21 = math.exp %20 : vector<8x8xf32>
    %cst_9 = arith.constant 1.000000e+00 : f32
    %22 = vector.broadcast %cst_9 : f32 to vector<8x8xf32>
    %23 = arith.addf %22, %21 : vector<8x8xf32>
    %24 = arith.divf %22, %23 : vector<8x8xf32>
    %25 = vector.extract_strided_slice %24 {offsets = [0, 0], sizes = [8, 1], strides = [1, 1]} : vector<8x8xf32> to vector<8x1xf32>
    %26 = vector.extract_strided_slice %24 {offsets = [0, 1], sizes = [8, 1], strides = [1, 1]} : vector<8x8xf32> to vector<8x1xf32>
    %27 = vector.extract_strided_slice %24 {offsets = [0, 2], sizes = [8, 1], strides = [1, 1]} : vector<8x8xf32> to vector<8x1xf32>
    %28 = vector.extract_strided_slice %24 {offsets = [0, 3], sizes = [8, 1], strides = [1, 1]} : vector<8x8xf32> to vector<8x1xf32>
    %29 = vector.extract_strided_slice %24 {offsets = [0, 4], sizes = [8, 1], strides = [1, 1]} : vector<8x8xf32> to vector<8x1xf32>
    %30 = vector.extract_strided_slice %24 {offsets = [0, 5], sizes = [8, 1], strides = [1, 1]} : vector<8x8xf32> to vector<8x1xf32>
    %31 = vector.extract_strided_slice %24 {offsets = [0, 6], sizes = [8, 1], strides = [1, 1]} : vector<8x8xf32> to vector<8x1xf32>
    %32 = vector.extract_strided_slice %24 {offsets = [0, 7], sizes = [8, 1], strides = [1, 1]} : vector<8x8xf32> to vector<8x1xf32>
    %33 = tpu.concatenate %25, %26, %27, %28, %29, %30, %31, %32 in 0 : vector<8x1xf32>, vector<8x1xf32>, vector<8x1xf32>, vector<8x1xf32>, vector<8x1xf32>, vector<8x1xf32>, vector<8x1xf32>, vector<8x1xf32> -> vector<64x1xf32>
    %c0_10 = arith.constant 0 : index
    %c0_11 = arith.constant 0 : index
    %34 = vector.load %arg1[%c0_10, %c0_11] : memref<64x128xf32, #tpu.memory_space<vmem>>, vector<64x128xf32>
    %35 = vector.broadcast %33 : vector<64x1xf32> to vector<64x128xf32>
    %36 = arith.mulf %34, %35 : vector<64x128xf32>
    %c0_12 = arith.constant 0 : index
    %c0_13 = arith.constant 0 : index
    %37 = vector.load %arg4[%c0_12, %c0_13] : memref<64x128xf32, #tpu.memory_space<vmem>>, vector<64x128xf32>
    tpu.vector_store %arg4[%c0_12, %c0_13], %36 {strides = array<i32>} : memref<64x128xf32, #tpu.memory_space<vmem>>, vector<64x128xf32>,
    return
  }
  func.func @transform_0(%arg0: i32) -> (i32, i32) {
    %c0_i32 = arith.constant 0 : i32
    %c0_i32_0 = arith.constant 0 : i32
    return %arg0, %c0_i32 : i32, i32
  }
  func.func @transform_1(%arg0: i32) -> (i32, i32) {
    %c0_i32 = arith.constant 0 : i32
    %c0_i32_0 = arith.constant 0 : i32
    %c0_i32_1 = arith.constant 0 : i32
    return %c0_i32, %c0_i32_0 : i32, i32
  }
  func.func @transform_2(%arg0: i32) -> (i32, i32) {
    %c0_i32 = arith.constant 0 : i32
    %c0_i32_0 = arith.constant 0 : i32
    %c0_i32_1 = arith.constant 0 : i32
    return %c0_i32, %c0_i32_0 : i32, i32
  }
  func.func @transform_3(%arg0: i32) -> (i32, i32) {
    %c0_i32 = arith.constant 0 : i32
    %c0_i32_0 = arith.constant 0 : i32
    return %arg0, %c0_i32 : i32, i32
  }
}

</mosaic_0001>

<bundles_post_ra>
// kernel: tpu_custom_call.1
= control target key start
LH: loop header
LB: loop body
LE: loop exit
PB: predicated region body
PF: predicated region fallthrough
CT: control target
= control target key end

     0   :  { %8 = vsyncpa [#allocation3], 0  ;;  %s384_s0 = inlined_call_operand.hbm [shape: f32[64,128], index: 0, kind: input, shape index: {}]   ;;  %s385_s1 = inlined_call_operand.vmem [shape: f32[4,8], index: 1, kind: input, shape index: {}]   ;;  %s386_s2 = inlined_call_operand.vmem [shape: f32[8,4], index: 2, kind: input, shape index: {}]   ;;  %s387_s3 = inlined_call_operand.hbm [shape: f32[64,128], index: 3, kind: output, shape index: {}]  }
   0x1   :  { %9 = vsyncpa [#allocation4], 0  ;;  %s14_s14 = sshll.u32 %s384_s0, 4  ;;  %s300_s15 = smov [#allocation2]   ;;  %s15_s14 = int_to_ptr.hbm [resolvable:$true] %s14_s14 }
   0x2   :  { %s16_s16 = sshll.u32 %s300_s15, 4  ;;  %s301_s17 = smov 128   ;;  %s17_s16 = int_to_ptr.vmem [resolvable:$true] %s16_s16 }
   0x3   :  { %s302_s18 = smov 8  }
   0x4   :  { %22 = dma.hbm_to_vmem [thread:$0]  %s15_s14, 1024, %s17_s16, [#allocation3], %s301_s17, %s301_s17, %s302_s18  }
   0x5   :  { %296 = dma.done.wait [#allocation3], 1024  }
   0x6   :  { %297 = vsyncadd [#allocation3], 4294966272  ;;  %v338_v0 = vld [vmem:[#allocation2] sm:$0xff]  ;;  %v340_v1 = vld [vmem:[#allocation2 + $0x10] sm:$0xff]  ;;  %vm55_vm0 = vcmask 7168   ;;  %vm57_vm1 = vcmask 15360  }
   0x7   :  { %v342_v2 = vld [vmem:[#allocation2 + $0x20] sm:$0xff]  ;;  %39 = vadd.xlane.f32.xlu0 %v338_v0  ;;  %43 = vadd.xlane.f32.xlu1 %v340_v1  ;;  %v347_v3 = vld [vmem:[#allocation2 + $0x8] sm:$0xff]  ;;  %v349_v4 = vld [vmem:[#allocation2 + $0x18] sm:$0xff]  ;;  %vm59_vm2 = vcmask 23552   ;;  %vm61_vm3 = vcmask 31744   ;;  %vm63_vm4 = vcmask 39936  }
   0x8   :  { %47 = vadd.xlane.f32.xlu2 %v342_v2  ;;  %v351_v5 = vld [vmem:[#allocation2 + $0x28] sm:$0xff]  ;;  %v356_v6 = vld [vmem:[#allocation2 + $0x30] sm:$0xff]  ;;  %v358_v7 = vld [vmem:[#allocation2 + $0x38] sm:$0xff]  ;;  %vm65_vm5 = vcmask 48128   ;;  %vm67_vm6 = vcmask 56320   ;;  %vm71_vm7 = vcmask 64512  }
   0x9   :  { %v70_v24 = vld [vmem:[%s385_s1] sm:$0xf]  ;;  %vm100_vm8 = vcmask 1043456   ;;  %v303_v30 = vmov 0   ;;  %s304_s1 = smov 125   ;;  %s306_s22 = smov 127  }
   0xa   :  { %v96_v27 = vld [vmem:[%s386_s2] sm:$0xff]  ;;  %241 = vset.pattern.permute.xlu0 %v303_v30  ;;  %242 = vset.pattern.permute.xlu2 %v303_v30  ;;  %s305_s2 = smov 126   ;;  %s307_s23 = smov 121  }
   0xb   :  { %243 = vset.pattern.permute.xlu1 %v303_v30  ;;  %s308_s24 = smov 123   ;;  %s309_s25 = smov 124  }
   0xc   :  { %s310_s26 = smov 122   ;;  %s311_s27 = smov [#allocation5]  }
   0xd   :  { %s210_s28 = sshll.u32 %s311_s27, 4  ;;  %s212_s4 = sshll.u32 %s387_s3, 4  ;;  %s211_s28 = int_to_ptr.vmem [resolvable:$true] %s210_s28  ;;  %s213_s4 = int_to_ptr.hbm [resolvable:$true] %s212_s4 }
   0xf   :  { %41 = vadd.xlane.f32.xlu0 %v347_v3  ;;  %45 = vadd.xlane.f32.xlu1 %v349_v4 }
  0x10   :  { %49 = vadd.xlane.f32.xlu2 %v351_v5 }
  0x17   :  { %51 = vadd.xlane.f32.xlu0 %v356_v6  ;;  %53 = vadd.xlane.f32.xlu1 %v358_v7 }
  0x7a   :  { %v40_v8 = vpop.xlane.xlu0 %39  ;;  %v44_v9 = vpop.xlane.xlu1 %43 }
  0x7b   :  { %v48_v10 = vpop.xlane.xlu2 %47 }
  0x82   :  { %v42_v11 = vpop.xlane.xlu0 %41  ;;  %v46_v12 = vpop.xlane.xlu1 %45 }
  0x83   :  { %v56_v13 = vsel %vm55_vm0, %v40_v8, %v42_v11  ;;  %v50_v16 = vpop.xlane.xlu2 %49 }
  0x84   :  { %v58_v14 = vsel %vm57_vm1, %v56_v13, %v44_v9 }
  0x85   :  { %v60_v15 = vsel %vm59_vm2, %v58_v14, %v46_v12 }
  0x86   :  { %v62_v17 = vsel %vm61_vm3, %v60_v15, %v48_v10 }
  0x87   :  { %v64_v18 = vsel %vm63_vm4, %v62_v17, %v50_v16 }
  0x8a   :  { %v52_v19 = vpop.xlane.xlu0 %51  ;;  %v54_v20 = vpop.xlane.xlu1 %53 }
  0x8b   :  { %v66_v21 = vsel %vm65_vm5, %v64_v18, %v52_v19 }
  0x8c   :  { %v68_v22 = vsel %vm67_vm6, %v66_v21, %v54_v20 }
  0x8d   :  { %v69_v23 = vmul.f32 0.0078125, %v68_v22 }
  0x8f   :  { %90 = vmatpush.msra.mxu0 %v69_v23 }
  0x90   :  { %225 = vmatmul.msk.f32.vlgmr.msra.gmra.mxu0 %vm71_vm7, %v70_v24 }
 0x10d   :  { %v92_v25 = vpop.f32.mrf.mxu0 }
 0x10e   :  { %v95_v26 = vmax.f32 %v92_v25, 0.0 }
 0x110   :  { %226 = vmatpush.msk.msra.mxu1 %vm100_vm8, %v95_v26 }
 0x111   :  { %227 = vmatmul.msk.f32.vlgmr.msra.gmra.mxu1 %vm61_vm3, %v96_v27 }
 0x18e   :  { %v121_v28 = vpop.f32.mrf.mxu1 }
 0x18f   :  { %v228_v29 = vmul.f32 -1.442695, %v121_v28 }
 0x191   :  { %244 = vpow2.f32 %v228_v29 }
 0x197   :  { %v245_v31 = vpop.eup %244 }
 0x198   :  { %v127_v32 = vadd.f32 1.0, %v245_v31 }
 0x19a   :  { %246 = vrcp.f32 %v127_v32  ;;  %v139_v36 = vand.u32 2147483648, %v127_v32  ;;  %v137_v38 = vand.u32 2147483647, %v127_v32  ;;  %vm133_vm10 = vweird.f32 %v127_v32 }
 0x19c   :  { %v140_v40 = vor.u32 1.1754944e-38, %v139_v36  ;;  %vm138_vm12 = vcmp.eq.f32.partialorder %v137_v38, 8.507059e+37 }
 0x1a0   :  { %v247_v33 = vpop.eup %246 }
 0x1a1   :  { %v129_v34 = vmul.f32 %v247_v33, %v127_v32  ;;  %vm134_vm9 = vweird.f32 %v247_v33 }
 0x1a2   :  { %vm135_vm11 = vmor %vm133_vm10, %vm134_vm9 }
 0x1a3   :  { %v130_v35 = vsub.f32 1.0, %v129_v34 }
 0x1a5   :  { %v131_v37 = vmul.f32 %v247_v33, %v130_v35 }
 0x1a7   :  { %v132_v39 = vadd.f32 %v247_v33, %v131_v37 }
 0x1a9   :  { %v136_v41 = vsel %vm135_vm11, %v247_v33, %v132_v39 }
 0x1aa   :  { %v141_v42 = vsel %vm138_vm12, %v140_v40, %v136_v41 }
 0x1ab   :  { %148 = vrot.lane.b32.xlu1 %v141_v42, %s304_s1  ;;  %146 = vrot.lane.b32.xlu0 %v141_v42, %s305_s2 }
 0x1ac   :  { %144 = vrot.lane.b32.xlu2 %v141_v42, %s306_s22 }
 0x1b3   :  { %156 = vrot.lane.b32.xlu1 %v141_v42, %s307_s23  ;;  %152 = vrot.lane.b32.xlu0 %v141_v42, %s308_s24 }
 0x1b4   :  { %150 = vrot.lane.b32.xlu2 %v141_v42, %s309_s25 }
 0x1bb   :  { %159 = vperm.xlu0 %241, %v141_v42  }
 0x1bc   :  { %154 = vrot.lane.b32.xlu2 %v141_v42, %s310_s26 }
 0x206   :  { %v145_v43 = vpop.permute.xlu2 %144 }
 0x207   :  { %163 = vperm.xlu2 %242, %v145_v43  }
 0x20e   :  { %v151_v44 = vpop.permute.xlu2 %150 }
 0x216   :  { %v155_v48 = vpop.permute.xlu2 %154 }
 0x21d   :  { %v149_v45 = vpop.permute.xlu1 %148  ;;  %v147_v46 = vpop.permute.xlu0 %146 }
 0x21e   :  { %167 = vperm.xlu1 %243, %v147_v46   ;;  %171 = vperm.xlu2 %242, %v149_v45  }
 0x225   :  { %v153_v47 = vpop.permute.xlu0 %152  ;;  %v157_v49 = vpop.permute.xlu1 %156 }
 0x226   :  { %179 = vperm.xlu0 %241, %v153_v47   ;;  %175 = vperm.xlu1 %243, %v151_v44  }
 0x227   :  { %183 = vperm.xlu2 %242, %v155_v48  }
 0x22d   :  { %v160_v50 = vpop.permute.xlu0 %159 }
 0x22e   :  { %v190_v51 = vmul.f32 %v160_v50, %v338_v0  ;;  %187 = vperm.xlu1 %243, %v157_v49  }
 0x230   :  { %198 = vst [vmem:[#allocation5] sm:$0xff] %v190_v51 }
 0x261   :  { %v164_v52 = vpop.permute.xlu2 %163 }
 0x262   :  { %v191_v53 = vmul.f32 %v164_v52, %v347_v3 }
 0x264   :  { %199 = vst [vmem:[#allocation5 + $0x8] sm:$0xff] %v191_v53 }
 0x278   :  { %v172_v54 = vpop.permute.xlu2 %171 }
 0x279   :  { %v193_v55 = vmul.f32 %v172_v54, %v349_v4 }
 0x27b   :  { %201 = vst [vmem:[#allocation5 + $0x18] sm:$0xff] %v193_v55 }
 0x281   :  { %v184_v56 = vpop.permute.xlu2 %183 }
 0x282   :  { %v196_v57 = vmul.f32 %v184_v56, %v356_v6 }
 0x284   :  { %204 = vst [vmem:[#allocation5 + $0x30] sm:$0xff] %v196_v57 }
 0x290   :  { %v168_v58 = vpop.permute.xlu1 %167 }
 0x291   :  { %v192_v59 = vmul.f32 %v168_v58, %v340_v1 }
 0x293   :  { %200 = vst [vmem:[#allocation5 + $0x10] sm:$0xff] %v192_v59 }
 0x298   :  { %v180_v60 = vpop.permute.xlu0 %179  ;;  %v176_v61 = vpop.permute.xlu1 %175 }
 0x299   :  { %v195_v62 = vmul.f32 %v180_v60, %v351_v5  ;;  %v194_v63 = vmul.f32 %v176_v61, %v342_v2 }
 0x29b   :  { %203 = vst [vmem:[#allocation5 + $0x28] sm:$0xff] %v195_v62 }
 0x29c   :  { %202 = vst [vmem:[#allocation5 + $0x20] sm:$0xff] %v194_v63 }
 0x2a0   :  { %v188_v0 = vpop.permute.xlu1 %187 }
 0x2a1   :  { %v197_v3 = vmul.f32 %v188_v0, %v358_v7 }
 0x2a3   :  { %205 = vst [vmem:[#allocation5 + $0x38] sm:$0xff] %v197_v3 }
 0x2a4   :  { %218 = dma.vmem_to_hbm [thread:$0]  %s211_s28, 1024, %s213_s4, [#allocation4], %s301_s17, %s301_s17, %s302_s18  }
 0x2a5   :  { %298 = dma.done.wait [#allocation4], 1024  }
 0x2a6   :  { %299 = vsyncadd [#allocation4], 4294966272 }
 0x2a7   :  { %223 = vsyncpa [#allocation3], 1 }
 0x2a8   :  { %224 = vsyncpa [#allocation4], 1 }

</bundles_post_ra>
